<compile_context>
chip_gen: v6e
topology: v6e:2x2x1
jax: 0.10.0
libtpu: 0.0.40
codegen_flags: <defaults>
</compile_context>

<pallas_src>
import jax
import jax.numpy as jnp
from jax.experimental import pallas as pl
from jax.experimental.pallas import tpu as pltpu


def _make_mlp_kernel(n_hidden, sub_per_step):
    """Fused MLP kernel: n_hidden x (Linear+ReLU) followed by Linear(->1).

    Ref order: xt, (w0, b0), ..., (w_{n-1}, b_{n-1}), w_out, b_out(SMEM), o.
    Layouts: xt [sub_per_step, F, SUB] bf16 (batch on lanes); w_l [out, in] bf16;
    b_l [out, 1] f32; w_out [H_last, 1] f32; b_out (1, 1) f32 in SMEM;
    o [sub_per_step, 1, SUB] f32.
    """

    def kernel(*refs):
        xt_ref = refs[0]
        w_out_ref = refs[-3]
        b_out_ref = refs[-2]
        o_ref = refs[-1]

        # Hoist all parameter loads out of the sub-loop (tiny, VMEM-resident).
        ws = [refs[1 + 2 * l][...] for l in range(n_hidden)]
        bs = [refs[2 + 2 * l][...] for l in range(n_hidden)]
        w_out = w_out_ref[...]                 # [H_last, 1] f32
        b_out = b_out_ref[0, 0]                # scalar f32 (SMEM)

        def sub_step(j, carry):
            h = xt_ref[j]                      # [F, SUB] bf16, batch on lanes
            for w, b in zip(ws, bs):
                # MXU matmul with f32 accumulation: h^T = W @ h^T -> [out, SUB]
                h = jnp.dot(w, h.astype(w.dtype),
                            preferred_element_type=jnp.float32)
                h = jnp.maximum(h + b, 0.0)    # bias + ReLU on the VPU (f32)
            # Final Linear(H_last -> 1): VPU multiply + sublane (XLU) reduce -> [1, SUB].
            out = jnp.sum(h * w_out, axis=0, keepdims=True) + b_out
            o_ref[j] = out.astype(o_ref.dtype)
            return carry

        # Short fixed trip count; unrolled so the LLO scheduler sees the whole step,
        # while still bounding live ranges per sub-step.
        jax.lax.fori_loop(0, sub_per_step, sub_step, 0, unroll=True)

    return kernel


def _round_up(n, m):
    return ((n + m - 1) // m) * m


def mlp_forward(x, params, *, compute_dtype=jnp.bfloat16):
    """x: [B, feature_dim] f32. params: PyTorch-layout {w_l: [out, in], b_l: [out]}.

    Returns [B, 1] f32 — same semantics as MLP.forward with activation_fn=nn.ReLU.
    """
    n_layers = len(params) // 2          # hidden layers + final Linear(->1)
    n_hidden = n_layers - 1
    assert n_hidden >= 1 and params[f"w{n_hidden}"].shape[0] == 1

    B, F = x.shape
    LANE = 128

    # Batch tiling: SUB lanes per sub-step (<= 512 to bound the live set), up to 4
    # sub-steps per grid step (TB up to 2048) to amortize the ~0.35 us per-step
    # overhead, while keeping >= 2 grid steps when there is enough work (v7x megacore).
    B_min = _round_up(max(B, 1), LANE)
    if B_min <= 512:
        SUB = B_min
        sub_per_step = 1
    else:
        SUB = 512
        n_sub_total = pl.cdiv(B, SUB)
        sub_per_step = min(4, max(1, n_sub_total // 2))
    TB = SUB * sub_per_step
    B_pad = _round_up(B, TB)
    NS_total = B_pad // SUB
    grid_steps = B_pad // TB

    x_pad = jnp.pad(x, ((0, B_pad - B), (0, 0))) if B_pad != B else x
    # Lane-dense, sub-blocked layout: [num_sub, F, SUB] with batch on the lane axis.
    xt3 = x_pad.reshape(NS_total, SUB, F).transpose(0, 2, 1).astype(compute_dtype)

    def _resident(arr):                  # whole array, constant index map
        nd = arr.ndim
        return pl.BlockSpec(arr.shape, lambda i, _nd=nd: (0,) * _nd)

    operands = [xt3]
    in_specs = [pl.BlockSpec((sub_per_step, F, SUB), lambda i: (i, 0, 0))]

    for l in range(n_hidden):
        w = params[f"w{l}"].astype(compute_dtype)            # [out, in] bf16 (MXU-native)
        b = params[f"b{l}"].astype(jnp.float32).reshape(-1, 1)
        operands += [w, b]
        in_specs += [_resident(w), _resident(b)]             # weights stay VMEM-resident

    w_out = params[f"w{n_hidden}"].astype(jnp.float32).reshape(-1, 1)   # [H_last, 1]
    b_out = params[f"b{n_hidden}"].astype(jnp.float32).reshape(1, 1)
    operands += [w_out, b_out]
    in_specs += [_resident(w_out),
                 pl.BlockSpec(memory_space=pltpu.MemorySpace.SMEM)]     # scalar bias in SMEM

    dims = [F] + [params[f"w{l}"].shape[0] for l in range(n_layers)]
    itemsize = jnp.dtype(compute_dtype).itemsize
    param_bytes = sum(int(o.size) * o.dtype.itemsize for o in operands[1:])
    cost = pl.CostEstimate(
        flops=2 * B_pad * sum(a * b for a, b in zip(dims[:-1], dims[1:])),
        transcendentals=0,
        bytes_accessed=int(xt3.size) * itemsize + B_pad * 4 + param_bytes,
    )

    out3 = pl.pallas_call(
        _make_mlp_kernel(n_hidden, sub_per_step),
        out_shape=jax.ShapeDtypeStruct((NS_total, 1, SUB), jnp.float32),
        grid=(grid_steps,),
        in_specs=in_specs,
        out_specs=pl.BlockSpec((sub_per_step, 1, SUB), lambda i: (i, 0, 0)),
        compiler_params=pltpu.CompilerParams(
            dimension_semantics=("parallel",),               # shard batch tiles over TCs
        ),
        cost_estimate=cost,
    )(*operands)

    # [NS_total, 1, SUB] -> [B_pad, 1] -> drop padded rows.
    return out3.reshape(B_pad, 1)[:B]


def init_mlp_params(key, feature_dim, net_arch):
    """Deterministic init matching nn.Linear defaults (U(+-1/sqrt(fan_in))), [out, in] layout."""
    dims = [feature_dim] + list(net_arch) + [1]
    params = {}
    for i, (d_in, d_out) in enumerate(zip(dims[:-1], dims[1:])):
        key, kw, kb = jax.random.split(key, 3)
        bound = 1.0 / (d_in ** 0.5)
        params[f"w{i}"] = jax.random.uniform(kw, (d_out, d_in), jnp.float32,
                                             minval=-bound, maxval=bound)
        params[f"b{i}"] = jax.random.uniform(kb, (d_out,), jnp.float32,
                                             minval=-bound, maxval=bound)
    return params


def mlp_reference(x, params, compute_dtype=jnp.float32):
    """Pure-JAX reference.  compute_dtype=bf16 mirrors the kernel's cast points exactly."""
    n_layers = len(params) // 2
    h = x
    for l in range(n_layers - 1):
        h = jnp.dot(h.astype(compute_dtype), params[f"w{l}"].astype(compute_dtype).T,
                    preferred_element_type=jnp.float32) + params[f"b{l}"]
        h = jnp.maximum(h, 0.0)
    l = n_layers - 1
    return jnp.dot(h, params[f"w{l}"].astype(jnp.float32).T,
                   preferred_element_type=jnp.float32) + params[f"b{l}"]


if __name__ == "__main__":
    feature_dim = 16            # matches "&input_size=16"
    net_arch = [32, 32]         # hidden layers, activation_fn = ReLU
    batch = 8

    key = jax.random.PRNGKey(0)
    key_x, key_p = jax.random.split(key)
    x = jax.random.normal(key_x, (batch, feature_dim), jnp.float32)
    params = init_mlp_params(key_p, feature_dim, net_arch)

    out = jax.block_until_ready(mlp_forward(x, params))

    ref_matched = mlp_reference(x, params, compute_dtype=jnp.bfloat16)  # kernel precision
    ref_f32 = mlp_reference(x, params, compute_dtype=jnp.float32)       # PyTorch f32 semantics

    assert out.shape == (batch, 1), out.shape
    assert jnp.allclose(out, ref_matched, atol=1e-3, rtol=1e-3), \
        "mismatch vs matched-precision reference"
    assert jnp.allclose(out, ref_f32, atol=2e-2, rtol=2e-2), "mismatch vs f32 reference"

    # Also exercise a larger batch that triggers multi-sub-step tiles and >1 grid step.
    xb = jax.random.normal(key_x, (3000, feature_dim), jnp.float32)
    outb = jax.block_until_ready(mlp_forward(xb, params))
    refb = mlp_reference(xb, params, compute_dtype=jnp.bfloat16)
    assert outb.shape == (3000, 1)
    assert jnp.allclose(outb, refb, atol=1e-3, rtol=1e-3), "large-batch mismatch"

    print("KERNEL_OK")
</pallas_src>

<mosaic_0001>
module attributes {stable_mosaic.version = 11 : i64} {
  func.func @kernel(%arg0: i32, %arg1: memref<1x16x128xbf16, #tpu.memory_space<vmem>>, %arg2: memref<32x16xbf16, #tpu.memory_space<vmem>>, %arg3: memref<32x1xf32, #tpu.memory_space<vmem>>, %arg4: memref<32x32xbf16, #tpu.memory_space<vmem>>, %arg5: memref<32x1xf32, #tpu.memory_space<vmem>>, %arg6: memref<32x1xf32, #tpu.memory_space<vmem>>, %arg7: memref<1x1xf32, #tpu.memory_space<smem>>, %arg8: memref<1x1x128xf32, #tpu.memory_space<vmem>>) attributes {dimension_semantics = [#tpu.dimension_semantics<parallel>], iteration_bounds = array<i64: 1>, scalar_prefetch = 0 : i64, scratch_operands = 0 : i64, tpu.core_type = #tpu.core_type<tc>, window_params = [{transform_indices = @transform_0, window_bounds = array<i64: 1, 16, 128>}, {pipeline_mode = #tpu.pipeline_mode<synchronous>, transform_indices = @transform_1, window_bounds = array<i64: 32, 16>}, {pipeline_mode = #tpu.pipeline_mode<synchronous>, transform_indices = @transform_2, window_bounds = array<i64: 32, 1>}, {pipeline_mode = #tpu.pipeline_mode<synchronous>, transform_indices = @transform_3, window_bounds = array<i64: 32, 32>}, {pipeline_mode = #tpu.pipeline_mode<synchronous>, transform_indices = @transform_4, window_bounds = array<i64: 32, 1>}, {pipeline_mode = #tpu.pipeline_mode<synchronous>, transform_indices = @transform_5, window_bounds = array<i64: 32, 1>}, {transform_indices = @transform_6, window_bounds = array<i64: 1, 1>}, {transform_indices = @transform_7, window_bounds = array<i64: 1, 1, 128>}]} {
    %c0 = arith.constant 0 : index
    %c0_0 = arith.constant 0 : index
    %0 = vector.load %arg2[%c0, %c0_0] : memref<32x16xbf16, #tpu.memory_space<vmem>>, vector<32x16xbf16>
    %c0_1 = arith.constant 0 : index
    %c0_2 = arith.constant 0 : index
    %1 = vector.load %arg4[%c0_1, %c0_2] : memref<32x32xbf16, #tpu.memory_space<vmem>>, vector<32x32xbf16>
    %c0_3 = arith.constant 0 : index
    %c0_4 = arith.constant 0 : index
    %2 = vector.load %arg3[%c0_3, %c0_4] : memref<32x1xf32, #tpu.memory_space<vmem>>, vector<32x1xf32>
    %c0_5 = arith.constant 0 : index
    %c0_6 = arith.constant 0 : index
    %3 = vector.load %arg5[%c0_5, %c0_6] : memref<32x1xf32, #tpu.memory_space<vmem>>, vector<32x1xf32>
    %c0_7 = arith.constant 0 : index
    %c0_8 = arith.constant 0 : index
    %4 = vector.load %arg6[%c0_7, %c0_8] : memref<32x1xf32, #tpu.memory_space<vmem>>, vector<32x1xf32>
    %c0_9 = arith.constant 0 : index
    %c0_10 = arith.constant 0 : index
    %5 = memref.load %arg7[%c0_9, %c0_10] : memref<1x1xf32, #tpu.memory_space<smem>>
    %c0_i32 = arith.constant 0 : i32
    %6 = arith.index_cast %c0_i32 : i32 to index
    %c0_11 = arith.constant 0 : index
    %c0_12 = arith.constant 0 : index
    %7 = vector.load %arg1[%6, %c0_11, %c0_12] : memref<1x16x128xbf16, #tpu.memory_space<vmem>>, vector<1x16x128xbf16>
    %8 = vector.shape_cast %7 : vector<1x16x128xbf16> to vector<16x128xbf16>
    %cst = arith.constant dense<0.000000e+00> : vector<32x128xf32>
    %9 = tpu.matmul %0, %8, %cst {dimension_numbers = #tpu.dot_dimension_numbers<[1], [0], [0], [1], [0, 0, 1, 1], [], []>} : vector<32x16xbf16>, vector<16x128xbf16>, vector<32x128xf32> -> vector<32x128xf32>
    %10 = vector.broadcast %2 : vector<32x1xf32> to vector<32x128xf32>
    %11 = arith.addf %9, %10 : vector<32x128xf32>
    %cst_13 = arith.constant 0.000000e+00 : f32
    %12 = vector.broadcast %cst_13 : f32 to vector<32x128xf32>
    %13 = arith.maximumf %11, %12 : vector<32x128xf32>
    %14 = arith.truncf %13 : vector<32x128xf32> to vector<32x128xbf16>
    %cst_14 = arith.constant dense<0.000000e+00> : vector<32x128xf32>
    %15 = tpu.matmul %1, %14, %cst_14 {dimension_numbers = #tpu.dot_dimension_numbers<[1], [0], [0], [1], [0, 0, 1, 1], [], []>} : vector<32x32xbf16>, vector<32x128xbf16>, vector<32x128xf32> -> vector<32x128xf32>
    %16 = vector.broadcast %3 : vector<32x1xf32> to vector<32x128xf32>
    %17 = arith.addf %15, %16 : vector<32x128xf32>
    %cst_15 = arith.constant 0.000000e+00 : f32
    %18 = vector.broadcast %cst_15 : f32 to vector<32x128xf32>
    %19 = arith.maximumf %17, %18 : vector<32x128xf32>
    %20 = vector.broadcast %4 : vector<32x1xf32> to vector<32x128xf32>
    %21 = arith.mulf %19, %20 : vector<32x128xf32>
    %cst_16 = arith.constant dense<0.000000e+00> : vector<128xf32>
    %22 = vector.multi_reduction <add>, %21, %cst_16 [0] : vector<32x128xf32> to vector<128xf32>
    %23 = vector.shape_cast %22 : vector<128xf32> to vector<1x128xf32>
    %24 = vector.broadcast %5 : f32 to vector<1x128xf32>
    %25 = arith.addf %23, %24 : vector<1x128xf32>
    %26 = arith.index_cast %c0_i32 : i32 to index
    %c0_17 = arith.constant 0 : index
    %c0_18 = arith.constant 0 : index
    %27 = vector.load %arg8[%26, %c0_17, %c0_18] : memref<1x1x128xf32, #tpu.memory_space<vmem>>, vector<1x1x128xf32>
    %28 = vector.shape_cast %27 : vector<1x1x128xf32> to vector<1x128xf32>
    %29 = vector.shape_cast %25 : vector<1x128xf32> to vector<1x1x128xf32>
    tpu.vector_store %arg8[%26, %c0_17, %c0_18], %29 {strides = array<i32>} : memref<1x1x128xf32, #tpu.memory_space<vmem>>, vector<1x1x128xf32>,
    %c1_i32 = arith.constant 1 : i32
    return
  }
  func.func @transform_0(%arg0: i32) -> (i32, i32, i32) {
    %c0_i32 = arith.constant 0 : i32
    %c0_i32_0 = arith.constant 0 : i32
    %c0_i32_1 = arith.constant 0 : i32
    return %arg0, %c0_i32, %c0_i32_0 : i32, i32, i32
  }
  func.func @transform_1(%arg0: i32) -> (i32, i32) {
    %c0_i32 = arith.constant 0 : i32
    %c0_i32_0 = arith.constant 0 : i32
    %c0_i32_1 = arith.constant 0 : i32
    return %c0_i32, %c0_i32_0 : i32, i32
  }
  func.func @transform_2(%arg0: i32) -> (i32, i32) {
    %c0_i32 = arith.constant 0 : i32
    %c0_i32_0 = arith.constant 0 : i32
    %c0_i32_1 = arith.constant 0 : i32
    return %c0_i32, %c0_i32_0 : i32, i32
  }
  func.func @transform_3(%arg0: i32) -> (i32, i32) {
    %c0_i32 = arith.constant 0 : i32
    %c0_i32_0 = arith.constant 0 : i32
    %c0_i32_1 = arith.constant 0 : i32
    return %c0_i32, %c0_i32_0 : i32, i32
  }
  func.func @transform_4(%arg0: i32) -> (i32, i32) {
    %c0_i32 = arith.constant 0 : i32
    %c0_i32_0 = arith.constant 0 : i32
    %c0_i32_1 = arith.constant 0 : i32
    return %c0_i32, %c0_i32_0 : i32, i32
  }
  func.func @transform_5(%arg0: i32) -> (i32, i32) {
    %c0_i32 = arith.constant 0 : i32
    %c0_i32_0 = arith.constant 0 : i32
    %c0_i32_1 = arith.constant 0 : i32
    return %c0_i32, %c0_i32_0 : i32, i32
  }
  func.func @transform_6(%arg0: i32) -> (i32, i32) {
    %c0_i32 = arith.constant 0 : i32
    %c0_i32_0 = arith.constant 0 : i32
    %c0_i32_1 = arith.constant 0 : i32
    return %c0_i32, %c0_i32_0 : i32, i32
  }
  func.func @transform_7(%arg0: i32) -> (i32, i32, i32) {
    %c0_i32 = arith.constant 0 : i32
    %c0_i32_0 = arith.constant 0 : i32
    %c0_i32_1 = arith.constant 0 : i32
    return %arg0, %c0_i32, %c0_i32_0 : i32, i32, i32
  }
}

</mosaic_0001>

<bundles_post_ra>
// kernel: tpu_custom_call.1
= control target key start
LH: loop header
LB: loop body
LE: loop exit
PB: predicated region body
PF: predicated region fallthrough
CT: control target
= control target key end

     0   :  { %vm88_vm0 = vcmask 130048   ;;  %v351_v3 = vmov 0   ;;  %s452_s0 = inlined_call_operand.vmem [shape: bf16[1,16,128], index: 0, kind: input, shape index: {}]   ;;  %s453_s1 = inlined_call_operand.vmem [shape: bf16[32,16], index: 1, kind: input, shape index: {}]   ;;  %s454_s2 = inlined_call_operand.vmem [shape: f32[32,1], index: 2, kind: input, shape index: {}]   ;;  %s455_s3 = inlined_call_operand.vmem [shape: bf16[32,32], index: 3, kind: input, shape index: {}]   ;;  %s456_s4 = inlined_call_operand.vmem [shape: f32[32,1], index: 4, kind: input, shape index: {}]   ;;  %s457_s5 = inlined_call_operand.vmem [shape: f32[32,1], index: 5, kind: input, shape index: {}]   ;;  %s458_s6 = inlined_call_operand.<no memory space> [shape: f32[1,1], index: 6, kind: input, shape index: {}]   ;;  %s459_s7 = inlined_call_operand.hbm [shape: f32[1,1,128], index: 7, kind: output, shape index: {}]  }
   0x1   :  { %v324_v0 = vld [vmem:[%s452_s0] sm:$0xff]   ;;  %v326_v2 = vld [vmem:[%s453_s1 + $0x8] sm:$0xff]   ;;  %322 = vset.pattern.permute.xlu0 %v351_v3  ;;  %v39_v4 = vld [vmem:[%s454_s2 + $0x10] sm:$0xff]  ;;  %323 = vset.pattern.permute.xlu1 %v351_v3 }
   0x2   :  { %v325_v1 = vld [vmem:[%s453_s1] sm:$0xff]   ;;  %306 = vmatprep.subr.bf16.mxu0 %v324_v0  ;;  %64 = vperm.xlu0 %322, %v39_v4   ;;  %v40_v6 = vld [vmem:[%s454_s2 + $0x18] sm:$0xff]  ;;  %v38_v7 = vld [vmem:[%s454_s2 + $0x8] sm:$0xff] }
   0x3   :  { %307 = vmatpush3.bf16.msra.mxu0 %v324_v0  ;;  %308 = vmatprep.mubr.msk.bf16.mxu0 %vm88_vm0, %v325_v1  ;;  %v37_v5 = vld [vmem:[%s454_s2] sm:$0xff] }
   0x4   :  { %54 = vperm.xlu1 %323, %v37_v5  }
   0x6   :  { %309 = vmatmul.mubr.msk.bf16.vlgmr.msra.gmra.mxu0 %vm88_vm0, %v326_v2  ;;  %69 = vperm.xlu0 %322, %v40_v6  }
   0x7   :  { %13 = vsyncpa [#allocation4], 0  ;;  %v41_v8 = vld [vmem:[%s456_s4] sm:$0xff]  ;;  %v42_v9 = vld [vmem:[%s456_s4 + $0x8] sm:$0xff]  ;;  %vm180_vm1 = vcmask 261120   ;;  %v273_v4 = vstv %s458_s6  ;;  %s352_s8 = smov [#allocation3]  }
   0x8   :  { %59 = vperm.xlu1 %323, %v38_v7   ;;  %v43_v10 = vld [vmem:[%s456_s4 + $0x10] sm:$0xff]  ;;  %v44_v11 = vld [vmem:[%s456_s4 + $0x18] sm:$0xff]  ;;  %v45_v12 = vld [vmem:[%s457_s5] sm:$0xff]  ;;  %s282_s9 = sshll.u32 %s352_s8, 4  ;;  %s283_s9 = int_to_ptr.vmem [resolvable:$true] %s282_s9 }
   0x9   :  { %v46_v13 = vld [vmem:[%s457_s5 + $0x8] sm:$0xff]  ;;  %v47_v14 = vld [vmem:[%s457_s5 + $0x10] sm:$0xff]  ;;  %v48_v15 = vld [vmem:[%s457_s5 + $0x18] sm:$0xff]  ;;  %s329_s0 = scalar_lea.vmem %s283_s9, 16  ;;  %s333_s10 = scalar_lea.vmem %s283_s9, 32 }
   0xa   :  { %152 = vperm.xlu0 %322, %v41_v8   ;;  %v327_v16 = vld [vmem:[%s455_s3] sm:$0xff]   ;;  %v328_v35 = vld [vmem:[%s455_s3 + $0x8] sm:$0xff]   ;;  %p330_p0 = scmp.ne.s32.totalorder %s283_s9, %s329_s0  ;;  %p334_p1 = scmp.lt.s32.totalorder %s283_s9, %s283_s9 }
   0xb   :  { %316 = vmatprep.mubr.msk.bf16.mxu1 %vm180_vm1, %v327_v16  ;;  %p335_p2 = scmp.lt.s32.totalorder %s333_s10, %s329_s0 }
   0xc   :  { %157 = vperm.xlu1 %323, %v42_v9  }
   0xd   :  { %p336_p3 = por %p335_p2, %p334_p1 }
   0xe   :  { %162 = vperm.xlu0 %322, %v43_v10  }
   0xf   :  { %p337_p4 = pnand %p336_p3, %p330_p0 }
  0x10   :  { %167 = vperm.xlu1 %323, %v44_v11  }
  0x12   :  { %242 = vperm.xlu0 %322, %v45_v12  }
  0x14   :  { %247 = vperm.xlu1 %323, %v46_v13  }
  0x16   :  { %252 = vperm.xlu0 %322, %v47_v14  }
  0x18   :  { %257 = vperm.xlu1 %323, %v48_v15  }
  0x7d   :  { %v65_v17 = vpop.permute.xlu0 %64 }
  0x7f   :  { %v55_v18 = vpop.permute.xlu1 %54 }
  0x81   :  { %v70_v22 = vpop.permute.xlu0 %69 }
  0x83   :  { %v60_v26 = vpop.permute.xlu1 %59 }
  0x85   :  { %v153_v36 = vpop.permute.xlu0 %152 }
  0x87   :  { %v158_v37 = vpop.permute.xlu1 %157 }
  0x89   :  { %v163_v38 = vpop.permute.xlu0 %162 }
  0x8b   :  { %v168_v40 = vpop.permute.xlu1 %167 }
  0x8d   :  { %v243_v45 = vpop.permute.xlu0 %242 }
  0x8f   :  { %v248_v50 = vpop.permute.xlu1 %247 }
  0x91   :  { %v253_v56 = vpop.permute.xlu0 %252 }
  0x93   :  { %v258_v59 = vpop.permute.xlu1 %257 }
  0xc6   :  { %v310_v19 = vpop.f32.mrf.mxu0 }
  0xc7   :  { %v138_v21 = vadd.f32 %v310_v19, %v65_v17 }
  0xc8   :  { %v129_v20 = vpop.f32.mrf.mxu0 }
  0xc9   :  { %v130_v24 = vadd.f32 %v129_v20, %v55_v18  ;;  %v146_v28 = vmax.f32 %v138_v21, 0.0 }
  0xca   :  { %v311_v23 = vpop.f32.mrf.mxu0 }
  0xcb   :  { %v141_v25 = vadd.f32 %v311_v23, %v70_v22  ;;  %v144_v31 = vmax.f32 %v130_v24, 0.0 }
  0xcc   :  { %v132_v27 = vpop.f32.mrf.mxu0 }
  0xcd   :  { %v147_v29 = vmax.f32 %v141_v25, 0.0  ;;  %v133_v30 = vadd.f32 %v132_v27, %v60_v26 }
  0xcf   :  { %v145_v32 = vmax.f32 %v133_v30, 0.0  ;;  %v149_v33 = vpack.c.bf16 %v147_v29, %v146_v28 }
  0xd1   :  { %v148_v34 = vpack.c.bf16 %v145_v32, %v144_v31  ;;  %312 = vmatprep.subr.bf16.mxu1 %v149_v33 }
  0xd2   :  { %313 = vmatpush3.bf16.msra.mxu1 %v149_v33 }
  0xd3   :  { %314 = vmatprep.subr.bf16.mxu1 %v148_v34 }
  0xd6   :  { %315 = vmatpush3.bf16.msra.mxu1 %v148_v34 }
  0xd9   :  { %317 = vmatmul.mubr.msk.bf16.vlgmr.msra.gmra.mxu1 %vm180_vm1, %v328_v35 }
 0x199   :  { %v318_v39 = vpop.f32.mrf.mxu1 }
 0x19a   :  { %v230_v44 = vadd.f32 %v318_v39, %v163_v38 }
 0x19b   :  { %v221_v41 = vpop.f32.mrf.mxu1 }
 0x19c   :  { %v222_v42 = vadd.f32 %v221_v41, %v153_v36  ;;  %v238_v51 = vmax.f32 %v230_v44, 0.0 }
 0x19d   :  { %v319_v43 = vpop.f32.mrf.mxu1 }
 0x19e   :  { %v236_v47 = vmax.f32 %v222_v42, 0.0  ;;  %v233_v48 = vadd.f32 %v319_v43, %v168_v40  ;;  %v262_v57 = vmul.f32 %v253_v56, %v238_v51 }
 0x19f   :  { %v224_v46 = vpop.f32.mrf.mxu1 }
 0x1a0   :  { %v225_v49 = vadd.f32 %v224_v46, %v158_v37  ;;  %v260_v53 = vmul.f32 %v243_v45, %v236_v47  ;;  %v239_v54 = vmax.f32 %v233_v48, 0.0 }
 0x1a2   :  { %v237_v52 = vmax.f32 %v225_v49, 0.0  ;;  %v263_v60 = vmul.f32 %v258_v59, %v239_v54 }
 0x1a4   :  { %v261_v55 = vmul.f32 %v248_v50, %v237_v52 }
 0x1a6   :  { %v264_v58 = vadd.f32 %v261_v55, %v260_v53 }
 0x1a8   :  { %v265_v61 = vadd.f32 %v264_v58, %v262_v57 }
 0x1aa   :  { %v266_v62 = vadd.f32 %v265_v61, %v263_v60 }
 0x1ac   :  { %v267_v63 = vrot.slane %v266_v62, 4 }
 0x1ae   :  { %v268_v0 = vadd.f32 %v267_v63, %v266_v62 }
 0x1b0   :  { %v269_v1 = vrot.slane %v268_v0, 2 }
 0x1b2   :  { %v270_v2 = vadd.f32 %v269_v1, %v268_v0 }
 0x1b4   :  { %v271_v3 = vrot.slane %v270_v2, 1 }
 0x1b6   :  { %v272_v5 = vadd.f32 %v271_v3, %v270_v2 }
 0x1b8   :  { %v274_v6 = vadd.f32 %v273_v4, %v272_v5 }
 0x1ba   :  { %275 = vst [vmem:[#allocation3] sm:$0x1] %v274_v6 }
 0x1bb   :  { %340 = shalt.err (!%p337_p4)
}
 0x1bc   :  { %285 = dma.vmem_to_hbm [thread:$0]  %s283_s9, 16, %s459_s7, [#allocation4]  }
 0x1bd   :  { %349 = dma.done.wait [#allocation4], 16  }
 0x1be   :  { %350 = vsyncadd [#allocation4], 4294967280 }
 0x1bf   :  { %289 = vsyncpa [#allocation4], 1 }

</bundles_post_ra>
